<compile_context>
chip_gen: v6e
topology: v6e:2x2x1
jax: 0.10.0
libtpu: 0.0.40
codegen_flags: <defaults>
</compile_context>

<pallas_src>
import functools

import jax
import jax.numpy as jnp
import numpy as np
from jax.experimental import pallas as pl
from jax.experimental.pallas import tpu as pltpu


def _focal_loss_tile_kernel(x_ref, t_ref, out_ref, *, alpha, gamma, eps, ls, oh_eps):
    # x_ref: (C, TILE) logits (any float dtype), t_ref: (1, TILE) int32 labels,
    # out_ref: (1, 128) f32 -- per-tile partial sum broadcast across the lane row.
    x = x_ref[...].astype(jnp.float32)                    # (C, T)
    t = t_ref[...]                                        # (1, T)
    C, T = x.shape

    # --- softmax over the class (sublane) axis --------------------------------
    m = jnp.max(x, axis=0, keepdims=True)                 # (1, T)
    xs = x - m                                            # (C, T)
    e = jnp.exp(xs)                                       # (C, T)  the only big EUP op
    denom = jnp.sum(e, axis=0, keepdims=True)             # (1, T)  sublane reduce
    inv_denom = pl.reciprocal(denom, approx=True)         # (1, T)  EUP rcp (cheap)
    p = e * inv_denom                                     # (C, T)  softmax
    p_eps = p + eps                                       # == input_soft of the reference
    # log(input_soft) via log-softmax: a single (1,T) log instead of a (C,T) log.
    # (+eps inside the log is dropped; |delta| ~ eps/p, negligible at eps=1e-8.)
    log_p = xs - jnp.log(denom)                           # (C, T)

    # --- one-hot(target)[:C] + 1e-6, then label smoothing ----------------------
    # Labels >= C (e.g. ignore_index) give an all-zero one-hot row, matching the
    # reference scatter into (ignore_index+1) channels followed by split[:C].
    c_idx = jax.lax.broadcasted_iota(jnp.int32, (C, T), 0)
    one_hot = jnp.where(c_idx == t, 1.0, 0.0) + oh_eps
    one_hot = (1.0 - ls) * one_hot + ls / C

    # --- focal term -------------------------------------------------------------
    w = 1.0 - p_eps
    g = float(gamma)
    if g == int(g) and 0 <= int(g) <= 4:
        weight = jnp.ones_like(w) if int(g) == 0 else w
        for _ in range(int(g) - 1):                       # gamma=2 -> one VPU multiply
            weight = weight * w
    else:
        weight = jnp.power(w, g)                          # non-integer gamma fallback
    focal = (-alpha) * weight * log_p                     # (C, T)

    # --- per-tile partial sum ---------------------------------------------------
    # TODO(synk): for C << 8, fold pixel groups into the idle sublanes (strided
    # class reduce) to recover the ~2x VPU/EUP sublane utilization noted in review.
    per_lane = jnp.sum(one_hot * focal, axis=0, keepdims=True)   # (1, T)
    tile_sum = jnp.sum(per_lane, axis=1, keepdims=True)          # (1, 1)
    out_ref[...] = jnp.broadcast_to(tile_sum, (1, 128)).astype(jnp.float32)


def _pick_pixel_tile(hw):
    # Largest lane-dense tile that evenly divides the per-sample pixel count.
    # >=1024 lanes reaches ~85% of HBM roofline; cap at 8192 so double-buffered
    # inputs stay ~1 MB even against v7x's smaller (64 MiB) VMEM.
    for t in (8192, 4096, 2048, 1024, 512, 256, 128):
        if hw % t == 0:
            return t
    # TODO(synk): masked-tail epilogue for H*W not a multiple of 128.
    raise ValueError("H*W must be a multiple of 128")


def focal_loss_pallas(logits_nchw, target_nhw, *, alpha=0.25, gamma=2.0,
                      eps=1e-8, ignore_index=30, ls=0.1, reduction="mean"):
    """Pallas implementation of FocalLoss.forward (reduction='mean'/'sum')."""
    if reduction not in ("mean", "sum"):
        # TODO(synk): reduction='none' needs a (N,1,P) per-pixel output block.
        raise NotImplementedError("only reduction='mean'/'sum' are implemented")
    if not isinstance(alpha, (int, float)):
        # TODO(synk): per-class ndarray alpha would multiply a broadcast (C,1) column.
        raise NotImplementedError("only scalar alpha is implemented")

    N, C, H, W = logits_nchw.shape
    HW = H * W
    P = N * HW
    tile = _pick_pixel_tile(HW)
    num_tiles = HW // tile

    # Free, layout-preserving reshapes — no transpose, no extra HBM pass.
    x_r = logits_nchw.reshape(N, C, HW)                   # keep input dtype (bf16 ok)
    t_r = target_nhw.reshape(N, 1, HW).astype(jnp.int32)

    kernel = functools.partial(
        _focal_loss_tile_kernel,
        alpha=float(alpha), gamma=float(gamma), eps=float(eps),
        ls=float(ls), oh_eps=1e-6)   # label_to_one_hot_label default eps

    partials = pl.pallas_call(
        kernel,
        out_shape=jax.ShapeDtypeStruct((N, 1, num_tiles * 128), jnp.float32),
        grid=(N, num_tiles),
        in_specs=[
            pl.BlockSpec((pl.Squeezed(), C, tile), lambda n, j: (n, 0, j)),
            pl.BlockSpec((pl.Squeezed(), 1, tile), lambda n, j: (n, 0, j)),
        ],
        out_specs=pl.BlockSpec((pl.Squeezed(), 1, 128), lambda n, j: (n, 0, j)),
        compiler_params=pltpu.CompilerParams(
            dimension_semantics=("parallel", "parallel"),
            vmem_limit_bytes=32 * 1024 * 1024),
    )(x_r, t_r)

    # Every (1,128) output row holds one per-tile partial sum broadcast across lanes.
    tile_sums = partials.reshape(N, num_tiles, 128)[:, :, 0]
    total = jnp.sum(tile_sums)
    if reduction == "sum":
        return total
    return total / jnp.float32(P)


def focal_loss_ref(logits_nchw, target_nhw, *, alpha=0.25, gamma=2.0,
                   eps=1e-8, ignore_index=30, ls=0.1):
    """Pure-JAX reference mirroring the PyTorch code exactly."""
    N, C, H, W = logits_nchw.shape
    input_soft = jax.nn.softmax(logits_nchw.astype(jnp.float32), axis=1) + eps
    one_hot_full = jax.nn.one_hot(target_nhw, ignore_index + 1,
                                  axis=1, dtype=jnp.float32) + 1e-6
    one_hot = one_hot_full[:, :C]
    one_hot = (1.0 - ls) * one_hot + ls / C
    weight = jnp.power(1.0 - input_soft, gamma)
    focal = -alpha * weight * jnp.log(input_soft)
    loss_tmp = jnp.sum(one_hot * focal, axis=1)
    return jnp.mean(loss_tmp)


if __name__ == "__main__":
    # FocalLoss.__init__ parameters.
    ALPHA = 0.25
    GAMMA = 2.0
    EPS = 1e-8
    IGNORE_INDEX = 30
    LS = 0.1

    N, C, H, W = 2, 4, 16, 16
    key = jax.random.PRNGKey(0)
    k1, k2 = jax.random.split(key)
    logits = jax.random.normal(k1, (N, C, H, W), dtype=jnp.float32)
    # labels in [0, C); sprinkle a few ignore_index pixels like real seg targets
    target = jax.random.randint(k2, (N, H, W), 0, C, dtype=jnp.int32)
    target = target.at[0, 0, :4].set(IGNORE_INDEX)

    loss = focal_loss_pallas(logits, target, alpha=ALPHA, gamma=GAMMA,
                             eps=EPS, ignore_index=IGNORE_INDEX, ls=LS)
    loss = jax.block_until_ready(loss)

    ref = jax.block_until_ready(
        focal_loss_ref(logits, target, alpha=ALPHA, gamma=GAMMA,
                       eps=EPS, ignore_index=IGNORE_INDEX, ls=LS))
    # rtol 2e-3: allows the approx-reciprocal softmax and log(p) vs log(p+eps) deltas.
    np.testing.assert_allclose(np.asarray(loss), np.asarray(ref), rtol=2e-3, atol=1e-5)

    print("KERNEL_OK")
</pallas_src>

<mosaic_0001>
module attributes {stable_mosaic.version = 11 : i64} {
  func.func @_focal_loss_tile_kernel(%arg0: i32, %arg1: i32, %arg2: memref<1x4x256xf32, #tpu.memory_space<vmem>>, %arg3: memref<1x1x256xi32, #tpu.memory_space<vmem>>, %arg4: memref<1x1x128xf32, #tpu.memory_space<vmem>>) attributes {dimension_semantics = [#tpu.dimension_semantics<parallel>, #tpu.dimension_semantics<parallel>], iteration_bounds = array<i64: 2, 1>, scalar_prefetch = 0 : i64, scratch_operands = 0 : i64, tpu.core_type = #tpu.core_type<tc>, window_params = [{transform_indices = @transform_0, window_bounds = array<i64: 1, 4, 256>}, {transform_indices = @transform_1, window_bounds = array<i64: 1, 1, 256>}, {transform_indices = @transform_2, window_bounds = array<i64: 1, 1, 128>}]} {
    %c0 = arith.constant 0 : index
    %c0_0 = arith.constant 0 : index
    %c0_1 = arith.constant 0 : index
    %0 = vector.load %arg2[%c0, %c0_0, %c0_1] : memref<1x4x256xf32, #tpu.memory_space<vmem>>, vector<1x4x256xf32>
    %1 = vector.shape_cast %0 : vector<1x4x256xf32> to vector<4x256xf32>
    %c0_2 = arith.constant 0 : index
    %c0_3 = arith.constant 0 : index
    %c0_4 = arith.constant 0 : index
    %2 = vector.load %arg3[%c0_2, %c0_3, %c0_4] : memref<1x1x256xi32, #tpu.memory_space<vmem>>, vector<1x1x256xi32>
    %3 = vector.shape_cast %2 : vector<1x1x256xi32> to vector<1x256xi32>
    %cst = arith.constant dense<0xFF800000> : vector<256xf32>
    %4 = vector.multi_reduction <maximumf>, %1, %cst [0] : vector<4x256xf32> to vector<256xf32>
    %5 = vector.shape_cast %4 : vector<256xf32> to vector<1x256xf32>
    %6 = vector.broadcast %5 : vector<1x256xf32> to vector<4x256xf32>
    %7 = arith.subf %1, %6 : vector<4x256xf32>
    %8 = math.exp %7 : vector<4x256xf32>
    %cst_5 = arith.constant dense<0.000000e+00> : vector<256xf32>
    %9 = vector.multi_reduction <add>, %8, %cst_5 [0] : vector<4x256xf32> to vector<256xf32>
    %10 = vector.shape_cast %9 : vector<256xf32> to vector<1x256xf32>
    %11 = tpu.reciprocal %10 {approx = true} : vector<1x256xf32> -> vector<1x256xf32>
    %12 = vector.broadcast %11 : vector<1x256xf32> to vector<4x256xf32>
    %13 = arith.mulf %8, %12 : vector<4x256xf32>
    %cst_6 = arith.constant 9.99999993E-9 : f32
    %14 = vector.broadcast %cst_6 : f32 to vector<4x256xf32>
    %15 = arith.addf %13, %14 : vector<4x256xf32>
    %16 = math.log %10 : vector<1x256xf32>
    %17 = vector.broadcast %16 : vector<1x256xf32> to vector<4x256xf32>
    %18 = arith.subf %7, %17 : vector<4x256xf32>
    %19 = tpu.iota {dimensions = array<i32: 0>} : vector<4x256xi32>
    %20 = vector.broadcast %3 : vector<1x256xi32> to vector<4x256xi32>
    %21 = arith.cmpi eq, %19, %20 : vector<4x256xi32>
    %cst_7 = arith.constant 1.000000e+00 : f32
    %cst_8 = arith.constant 0.000000e+00 : f32
    %22 = vector.broadcast %cst_7 : f32 to vector<4x256xf32>
    %23 = vector.broadcast %cst_8 : f32 to vector<4x256xf32>
    %24 = arith.select %21, %22, %23 : vector<4x256xi1>, vector<4x256xf32>
    %cst_9 = arith.constant 9.99999997E-7 : f32
    %25 = vector.broadcast %cst_9 : f32 to vector<4x256xf32>
    %26 = arith.addf %24, %25 : vector<4x256xf32>
    %cst_10 = arith.constant 0.899999976 : f32
    %27 = vector.broadcast %cst_10 : f32 to vector<4x256xf32>
    %28 = arith.mulf %27, %26 : vector<4x256xf32>
    %cst_11 = arith.constant 2.500000e-02 : f32
    %29 = vector.broadcast %cst_11 : f32 to vector<4x256xf32>
    %30 = arith.addf %28, %29 : vector<4x256xf32>
    %cst_12 = arith.constant 1.000000e+00 : f32
    %31 = vector.broadcast %cst_12 : f32 to vector<4x256xf32>
    %32 = arith.subf %31, %15 : vector<4x256xf32>
    %33 = arith.mulf %32, %32 : vector<4x256xf32>
    %cst_13 = arith.constant -2.500000e-01 : f32
    %34 = vector.broadcast %cst_13 : f32 to vector<4x256xf32>
    %35 = arith.mulf %34, %33 : vector<4x256xf32>
    %36 = arith.mulf %35, %18 : vector<4x256xf32>
    %37 = arith.mulf %30, %36 : vector<4x256xf32>
    %cst_14 = arith.constant dense<0.000000e+00> : vector<256xf32>
    %38 = vector.multi_reduction <add>, %37, %cst_14 [0] : vector<4x256xf32> to vector<256xf32>
    %39 = vector.shape_cast %38 : vector<256xf32> to vector<1x256xf32>
    %cst_15 = arith.constant dense<0.000000e+00> : vector<1xf32>
    %40 = vector.multi_reduction <add>, %39, %cst_15 [1] : vector<1x256xf32> to vector<1xf32>
    %41 = vector.shape_cast %40 : vector<1xf32> to vector<1x1xf32>
    %42 = vector.shape_cast %41 : vector<1x1xf32> to vector<1x1xf32>
    %43 = vector.broadcast %42 : vector<1x1xf32> to vector<1x128xf32>
    %c0_16 = arith.constant 0 : index
    %c0_17 = arith.constant 0 : index
    %c0_18 = arith.constant 0 : index
    %44 = vector.load %arg4[%c0_16, %c0_17, %c0_18] : memref<1x1x128xf32, #tpu.memory_space<vmem>>, vector<1x1x128xf32>
    %45 = vector.shape_cast %44 : vector<1x1x128xf32> to vector<1x128xf32>
    %46 = vector.shape_cast %43 : vector<1x128xf32> to vector<1x1x128xf32>
    tpu.vector_store %arg4[%c0_16, %c0_17, %c0_18], %46 {strides = array<i32>} : memref<1x1x128xf32, #tpu.memory_space<vmem>>, vector<1x1x128xf32>,
    return
  }
  func.func @transform_0(%arg0: i32, %arg1: i32) -> (i32, i32, i32) {
    %c0_i32 = arith.constant 0 : i32
    %c0_i32_0 = arith.constant 0 : i32
    return %arg0, %c0_i32, %arg1 : i32, i32, i32
  }
  func.func @transform_1(%arg0: i32, %arg1: i32) -> (i32, i32, i32) {
    %c0_i32 = arith.constant 0 : i32
    %c0_i32_0 = arith.constant 0 : i32
    return %arg0, %c0_i32, %arg1 : i32, i32, i32
  }
  func.func @transform_2(%arg0: i32, %arg1: i32) -> (i32, i32, i32) {
    %c0_i32 = arith.constant 0 : i32
    %c0_i32_0 = arith.constant 0 : i32
    return %arg0, %c0_i32, %arg1 : i32, i32, i32
  }
}

</mosaic_0001>

<bundles_post_ra>
// kernel: tpu_custom_call.1
= control target key start
LH: loop header
LB: loop body
LE: loop exit
PB: predicated region body
PF: predicated region fallthrough
CT: control target
= control target key end

     0   :  { %7 = vsyncpa [#allocation3], 0  ;;  %s885_s0 = inlined_call_operand.hbm [shape: f32[2,4,256], index: 0, kind: input, shape index: {}]   ;;  %s886_s1 = inlined_call_operand.hbm [shape: s32[2,1,256], index: 1, kind: input, shape index: {}]   ;;  %s887_s2 = inlined_call_operand.hbm [shape: f32[2,1,128], index: 2, kind: output, shape index: {}]  }
   0x1   :  { %9 = vsyncpa [#allocation3 + $0x1], 0 }
   0x2   :  { %10 = vsyncpa [#allocation6], 0 }
   0x3   :  { %12 = vsyncpa [#allocation6 + $0x1], 0 }
   0x4   :  { %13 = vsyncpa [#allocation4], 0 }
   0x5   :  { %15 = vsyncpa [#allocation4 + $0x1], 0  ;;  %s705_s9 = smov 0   ;;  %s707_s10 = smov 0  }
   0x6   :  { %s709_s11 = smov 0   ;;  %s711_s12 = smov 0  }
   0x7   :  { %s713_s13 = smov 0   ;;  %s715_s14 = smov 0  }
   0x8 LB: > { %s447_s15 = sadd.s32 4294967295, %s684_s14   ;;  %s448_s16 = sadd.s32 4294967294, %s684_s14   ;;  %s684_s14 = sphi %s715_s14, %s21_s14   ;;  %s680_s13 = sphi %s713_s13, %s899_s13   ;;  %s676_s12 = sphi %s711_s12, %s898_s12   ;;  %s672_s11 = sphi %s709_s11, %s897_s11   ;;  %s668_s10 = sphi %s707_s10, %s896_s10   ;;  %s664_s9 = sphi %s705_s9, %s895_s9  }
   0x9   : > { %s33_s17 = sadd.s32 1, %s680_s13  ;;  %s42_s18 = sadd.s32 1, %s672_s11 }
   0xa   : > { %p35_p0 = scmp.ge.s32.totalorder %s33_s17, 2  ;;  %p49_p1 = scmp.ne.s32.totalorder %s672_s11, %s668_s10 }
   0xb   : > { %p50_p2 = scmp.eq.s32.totalorder %s684_s14, 0  ;;  %p55_p3 = scmp.ne.s32.totalorder %s668_s10, %s664_s9 }
   0xc   : > { %s901_s17 = smov (%p35_p0, %s33_s17), 0  ;;  %p56_p5 = scmp.eq.s32.totalorder %s447_s15, 0 }
   0xd   : > { %p746_p4 = por %p50_p2, %p49_p1  ;;  %s37_s20 = ssub.s32 %s680_s13, %s901_s17 }
   0xe   : > { %p109_p6 = scmp.eq.s32.totalorder %s447_s15, 1  ;;  %p40_p7 = scmp.eq.s32.totalorder %s37_s20, 0 }
   0xf   : > { %p752_p8 = por %p56_p5, %p55_p3  ;;  %p115_p10 = scmp.eq.s32.totalorder %s448_s16, 1 }
  0x10   : > { %p756_p9 = por %p109_p6, %p49_p1  ;;  %p482_p13 = scmp.lt.s32.totalorder %s684_s14, 2 }
  0x11   : > { %s761_s23 = scalar_select %p40_p7, %s672_s11, %s42_s18  }
  0x12   : > { %p763_p11 = por %p115_p10, %p55_p3  ;;  %s770_s25 = sand.u32 1, %s672_s11  }
  0x13   : > { %s451_s26 = sshll.u32 %s770_s25, 3  ;;  %s463_s27 = sshll.u32 %s680_s13, 7 }
  0x14   : > { %s147_s30 = scalar_lea.hbm %s885_s0, %s463_s27  ;;  %s139_s3 = scalar_lea.vmem [#allocation2], %s451_s26 }
  0x15   : > { %s149_s4 = sshll.u32 %s139_s3, 4  ;;  %p779_p0 = pnand %p482_p13, %p746_p4  ;;  %s150_s4 = int_to_ptr.vmem [resolvable:$true] %s149_s4 }
  0x16   : > { %p457_p1 = scmp.ge.s32.totalorder %s684_s14, 1  ;;  %p175_p2 = scmp.lt.s32.totalorder %s684_s14, 3 }
  0x17   : > { %s136_s6 = scalar_lea.sflag [#allocation3], %s770_s25  ;;  %p546_p3 = pneg %p779_p0 }
  0x18   : > { %s557_s7 = scalar_lea.vmem %s150_s4, 128  ;;  %s686_s8 = smov [#allocation2]  }
  0x19   : > { %p558_p5 = scmp.ne.s32.totalorder %s150_s4, %s557_s7  ;;  %s562_s15 = sshll.u32 %s686_s8, 4  ;;  %s563_s15 = int_to_ptr.vmem [resolvable:$false] %s562_s15 }
  0x1a   : > { %s564_s16 = scalar_lea.vmem %s563_s15, 256  ;;  %p565_p4 = scmp.lt.s32.totalorder %s150_s4, %s563_s15 }
  0x1b   : > { %p560_p6 = pnand %p558_p5, %p546_p3  ;;  %p566_p10 = scmp.lt.s32.totalorder %s564_s16, %s557_s7 }
  0x1d   : > { %p561_p7 = pneg %p560_p6  ;;  %p567_p13 = por %p566_p10, %p565_p4 }
  0x1f   : > { %p568_p12 = pnand %p567_p13, %p561_p7 }
  0x21   : > { %571 = shalt.err (!%p568_p12)
}
  0x22   : > { %474 = dma.hbm_to_vmem [thread:$0]  (!%p779_p0), %s147_s30, 128, %s150_s4, %s136_s6  }
  0x23   : > { %p797_p5 = pnand %p457_p1, %p175_p2  ;;  %s454_s19 = sshll.u32 %s770_s25, 1 }
  0x24   : > { %s464_s20 = sshll.u32 %s680_s13, 5  ;;  %s160_s29 = scalar_lea.vmem [#allocation5], %s454_s19 }
  0x25   : > { %s168_s28 = scalar_lea.hbm %s886_s1, %s464_s20  ;;  %s170_s3 = sshll.u32 %s160_s29, 4  ;;  %s171_s3 = int_to_ptr.vmem [resolvable:$true] %s170_s3 }
  0x26   : > { %s157_s7 = scalar_lea.sflag [#allocation6], %s770_s25  ;;  %s585_s8 = scalar_lea.vmem %s171_s3, 32 }
  0x27   : > { %p586_p12 = scmp.ne.s32.totalorder %s171_s3, %s585_s8  ;;  %s687_s30 = smov [#allocation5]  }
  0x28   : > { %s590_s4 = sshll.u32 %s687_s30, 4  ;;  %s591_s4 = int_to_ptr.vmem [resolvable:$false] %s590_s4 }
  0x29   : > { %p588_p6 = pnand %p586_p12, %p546_p3  ;;  %s592_s6 = scalar_lea.vmem %s591_s4, 64 }
  0x2a   : > { %p593_p1 = scmp.lt.s32.totalorder %s171_s3, %s591_s4  ;;  %p594_p2 = scmp.lt.s32.totalorder %s592_s6, %s585_s8 }
  0x2b   : > { %p589_p7 = pneg %p588_p6 }
  0x2c   : > { %p595_p4 = por %p594_p2, %p593_p1 }
  0x2e   : > { %p596_p10 = pnand %p595_p4, %p589_p7 }
  0x30   : > { %599 = shalt.err (!%p596_p10)
}
  0x31   : > { %477 = dma.hbm_to_vmem [thread:$0]  (!%p779_p0), %s168_s28, 32, %s171_s3, %s157_s7  }
  0x32   : > { %179 = sbr.rel (%p797_p5) target bundleno = 308 (0x134), region = 28  ;;  %s815_s25 = sand.u32 (!%p797_p5), 1, %s668_s10  }
  0x33   : > { %s458_s15 = sshll.u32 (!%p797_p5), %s815_s25, 3  ;;  %s182_s16 = scalar_lea.sflag (!%p797_p5), [#allocation3], %s815_s25 }
  0x34   : > { %s185_s19 = scalar_lea.vmem (!%p797_p5), [#allocation2], %s458_s15 }
  0x37   : > { %651 = dma.done.wait (%p752_p8), %s182_s16, 128  }
  0x38   : > { %653 = vsyncadd (%p752_p8), %s182_s16, 4294967168  ;;  %s459_s5 = sshll.u32 %s815_s25, 1  ;;  %s191_s18 = scalar_lea.sflag [#allocation6], %s815_s25 }
  0x39   : > { %s825_s20 = scalar_lea.vmem [#allocation5], %s459_s5 }
  0x3a   : > { %655 = dma.done.wait (%p752_p8), %s191_s18, 32  }
  0x3b   : > { %657 = vsyncadd (%p752_p8), %s191_s18, 4294967264  ;;  %vm226_vm0 = vcmask 1043456   ;;  %v221_v0 = vld [vmem:[%s185_s19] sm:$0xff]  ;;  %v282_v32 = vlaneseq  ;;  %v222_v38 = vld [vmem:[%s825_s20] sm:$0x3]  ;;  %v688_v45 = vmov 0.0  }
  0x3c   : > { %v224_v1 = vcombine.high %v221_v0, %v221_v0  ;;  %v227_v2 = vsel %vm226_vm0, %v221_v0, -inf  ;;  %s218_s21 = scalar_lea.vmem [#allocation7], %s815_s25  ;;  %s460_s27 = sshll.u32 %s676_s12, 4 }
  0x3d   : > { %v228_v3 = vrot.slane %v227_v2, 4  ;;  %v283_v36 = vshrl.u32 %v282_v32, 7  ;;  %s343_s26 = sshll.u32 %s218_s21, 4  ;;  %s341_s3 = scalar_lea.hbm %s887_s2, %s460_s27  ;;  %s840_s26 = int_to_ptr.vmem [resolvable:$true] %s343_s26 }
  0x3e   : > { %v234_v4 = vsel %vm226_vm0, %v224_v1, -inf  ;;  %s330_s7 = scalar_lea.sflag [#allocation4], %s815_s25  ;;  %s600_s8 = scalar_lea.vmem %s840_s26, 16 }
  0x3f   : > { %v229_v5 = vmax.f32 %v227_v2, %v228_v3  ;;  %v235_v6 = vrot.slane %v234_v4, 4  ;;  %v286_v37 = vsub.s32 0, %v283_v36  ;;  %v290_v39 = vsub.s32 1, %v283_v36  ;;  %p601_p8 = scmp.ne.s32.totalorder %s840_s26, %s600_s8  ;;  %s689_s30 = smov [#allocation7]  }
  0x40   : > { %s604_s4 = sshll.u32 %s689_s30, 4  ;;  %s605_s4 = int_to_ptr.vmem [resolvable:$false] %s604_s4 }
  0x41   : > { %v230_v7 = vrot.slane %v229_v5, 2  ;;  %v236_v8 = vmax.f32 %v234_v4, %v235_v6  ;;  %v287_v40 = vrot.slane %v222_v38, %v286_v37  ;;  %v291_v41 = vrot.slane %v222_v38, %v290_v39  ;;  %p602_p0 = pnand %p601_p8, %p756_p9  ;;  %s606_s12 = scalar_lea.vmem %s605_s4, 32 }
  0x42   : > { %p607_p13 = scmp.lt.s32.totalorder %s840_s26, %s605_s4  ;;  %p608_p5 = scmp.lt.s32.totalorder %s606_s12, %s600_s8 }
  0x43   : > { %v231_v9 = vmax.f32 %v229_v5, %v230_v7  ;;  %v237_v10 = vrot.slane %v236_v8, 2  ;;  %vm292_vm1 = vcmp.eq.s32.totalorder %v283_v36, %v287_v40  ;;  %vm293_vm2 = vcmp.eq.s32.totalorder %v283_v36, %v291_v41  ;;  %p603_p3 = pneg %p602_p0 }
  0x44   : > { %v294_v46 = vsel %vm292_vm1, 1.0, %v688_v45  ;;  %v295_v51 = vsel %vm293_vm2, 1.0, %v688_v45  ;;  %p609_p12 = por %p608_p5, %p607_p13 }
  0x45   : > { %v232_v11 = vrot.slane %v231_v9, 1  ;;  %v238_v12 = vmax.f32 %v236_v8, %v237_v10  ;;  %v296_v53 = vadd.f32 1e-06, %v294_v46  ;;  %v297_v56 = vadd.f32 1e-06, %v295_v51 }
  0x46   : > { %p610_p6 = pnand %p609_p12, %p603_p3 }
  0x47   : > { %v233_v13 = vmax.f32 %v231_v9, %v232_v11  ;;  %v239_v14 = vrot.slane %v238_v12, 1  ;;  %v298_v57 = vmul.f32 0.9, %v296_v53  ;;  %v299_v60 = vmul.f32 0.9, %v297_v56 }
  0x49   : > { %v240_v15 = vmax.f32 %v238_v12, %v239_v14  ;;  %v300_v62 = vadd.f32 0.025, %v298_v57 }
  0x4b   : > { %v243_v16 = vcombine.low %v233_v13, %v240_v15 }
  0x4d   : > { %v245_v17 = vsub.f32 %v221_v0, %v243_v16  ;;  %v301_v0 = vadd.f32 0.025, %v299_v60 }
  0x4f   : > { %v246_v18 = vmul.f32 1.442695, %v245_v17 }
  0x51   : > { %534 = vpow2.f32 %v246_v18 }
  0x5e   : > { %v535_v19 = vpop.eup %534 }
  0x5f   : > { %v249_v20 = vcombine.high %v535_v19, %v535_v19  ;;  %v251_v21 = vsel %vm226_vm0, %v535_v19, 0.0 }
  0x60   : > { %v252_v22 = vrot.slane %v251_v21, 4 }
  0x61   : > { %v258_v23 = vsel %vm226_vm0, %v249_v20, 0.0 }
  0x62   : > { %v253_v24 = vadd.f32 %v252_v22, %v251_v21  ;;  %v259_v25 = vrot.slane %v258_v23, 4 }
  0x64   : > { %v254_v26 = vrot.slane %v253_v24, 2  ;;  %v260_v27 = vadd.f32 %v259_v25, %v258_v23 }
  0x66   : > { %v255_v28 = vadd.f32 %v254_v26, %v253_v24  ;;  %v261_v29 = vrot.slane %v260_v27, 2 }
  0x68   : > { %v256_v30 = vrot.slane %v255_v28, 1  ;;  %v262_v31 = vadd.f32 %v261_v29, %v260_v27 }
  0x6a   : > { %v257_v33 = vadd.f32 %v256_v30, %v255_v28  ;;  %v263_v34 = vrot.slane %v262_v31, 1 }
  0x6c   : > { %v264_v35 = vadd.f32 %v263_v34, %v262_v31  ;;  %536 = vrcp.f32 %v257_v33 }
  0x6d   : > { %538 = vlog2.f32 %v257_v33 }
  0x6e   : > { %540 = vrcp.f32 %v264_v35 }
  0x6f   : > { %542 = vlog2.f32 %v264_v35 }
  0x79   : > { %v537_v42 = vpop.eup %536 }
  0x7a   : > { %v539_v43 = vpop.eup %538 }
  0x7b   : > { %v541_v44 = vpop.eup %540  ;;  %v274_v49 = vmul.f32 0.6931472, %v539_v43 }
  0x7c   : > { %v543_v47 = vpop.eup %542  ;;  %v269_v48 = vcombine.low %v537_v42, %v541_v44 }
  0x7d   : > { %v276_v50 = vmul.f32 0.6931472, %v543_v47 }
  0x7e   : > { %v271_v52 = vmul.f32 %v535_v19, %v269_v48 }
  0x7f   : > { %v279_v55 = vcombine.low %v274_v49, %v276_v50 }
  0x80   : > { %v272_v54 = vadd.f32 1e-08, %v271_v52 }
  0x81   : > { %v281_v59 = vsub.f32 %v245_v17, %v279_v55 }
  0x82   : > { %v302_v58 = vsub.f32 1.0, %v272_v54 }
  0x84   : > { %v303_v61 = vmul.f32 %v302_v58, %v302_v58 }
  0x86   : > { %v304_v63 = vmul.f32 -0.25, %v303_v61 }
  0x88   : > { %v305_v1 = vmul.f32 %v304_v63, %v281_v59 }
  0x8a   : > { %v307_v2 = vcombine.high %v305_v1, %v305_v1  ;;  %v309_v3 = vmul.f32 %v305_v1, %v300_v62 }
  0x8c   : > { %v310_v4 = vmul.f32 %v307_v2, %v301_v0  ;;  %v311_v5 = vsel %vm226_vm0, %v309_v3, 0.0 }
  0x8d   : > { %v312_v6 = vrot.slane %v311_v5, 4 }
  0x8e   : > { %v318_v7 = vsel %vm226_vm0, %v310_v4, 0.0 }
  0x8f   : > { %v313_v8 = vadd.f32 %v312_v6, %v311_v5  ;;  %v319_v9 = vrot.slane %v318_v7, 4 }
  0x91   : > { %v314_v10 = vrot.slane %v313_v8, 2  ;;  %v320_v11 = vadd.f32 %v319_v9, %v318_v7 }
  0x93   : > { %v315_v12 = vadd.f32 %v314_v10, %v313_v8  ;;  %v321_v13 = vrot.slane %v320_v11, 2 }
  0x95   : > { %v316_v14 = vrot.slane %v315_v12, 1  ;;  %v322_v15 = vadd.f32 %v321_v13, %v320_v11 }
  0x97   : > { %v317_v16 = vadd.f32 %v316_v14, %v315_v12  ;;  %v323_v17 = vrot.slane %v322_v15, 1 }
  0x99   : > { %v324_v18 = vadd.f32 %v323_v17, %v322_v15 }
  0x9b   : > { %v325_v19 = vadd.f32 %v324_v18, %v317_v16 }
  0x9d   : > { %326 = vadd.xlane.f32.xlu0 %v325_v19 }
 0x126   : > { %v327_v20 = vpop.xlane.xlu0 %326 }
 0x127   : > { %328 = vst [vmem:[%s218_s21] sm:$0x1] %v327_v20 }
 0x128   : > { %613 = shalt.err (!%p610_p6)
}
 0x129   : > { %s614_s6 = scalar_lea.hbm %s341_s3, 16  ;;  %s618_s16 = scalar_lea.hbm %s887_s2, 32 }
 0x12a   : > { %p615_p7 = scmp.ne.s32.totalorder %s341_s3, %s614_s6  ;;  %p619_p4 = scmp.lt.s32.totalorder %s341_s3, %s887_s2 }
 0x12b   : > { %p620_p10 = scmp.lt.s32.totalorder %s618_s16, %s614_s6 }
 0x12c   : > { %p616_p1 = pnand %p615_p7, %p756_p9 }
 0x12d   : > { %p621_p8 = por %p620_p10, %p619_p4 }
 0x12e   : > { %p617_p2 = pneg %p616_p1 }
 0x130   : > { %p622_p0 = pnand %p621_p8, %p617_p2 }
 0x132   : > { %625 = shalt.err (!%p622_p0)
}
 0x133   : > { %469 = dma.vmem_to_hbm [thread:$0]  (%p756_p9), %s840_s26, 16, %s341_s3, %s330_s7  }
 0x134 PF: > { %s355_s18 = sand.u32 1, %s664_s9   ;;  %p894_p3 = scmp.ge.s32.totalorder %s684_s14, 2 }
 0x135   : > { %s356_s20 = scalar_lea.sflag [#allocation4], %s355_s18 }
 0x136   : > { %p479_p13 = pnand %p894_p3, %p763_p11 }
 0x138   : > { %p480_p5 = pneg %p479_p13 }
 0x13a   : > { %659 = dma.done.wait (%p480_p5), %s356_s20, 16  }
 0x13b   : > { %661 = vsyncadd (%p480_p5), %s356_s20, 4294967280  ;;  %s21_s14 = sadd.s32 1, %s684_s14   ;;  %s895_s9 = smov %s668_s10 }
 0x13c   : > { %p18_p12 = scmp.ge.s32.totalorder %s21_s14, 4   ;;  %s896_s10 = smov %s672_s11 }
 0x13d   : > { %s897_s11 = smov %s761_s23  ;;  %s898_s12 = smov %s680_s13 }
 0x13e   : > { %s899_s13 = smov %s901_s17  ;;  %20 = sbr.rel (!%p18_p12) target bundleno = 8 (0x8), region = 86 }
 0x143   :  { %360 = vsyncpa [#allocation3], 1 }
 0x144   :  { %362 = vsyncpa [#allocation3 + $0x1], 1 }
 0x145   :  { %363 = vsyncpa [#allocation6], 1 }
 0x146   :  { %365 = vsyncpa [#allocation6 + $0x1], 1 }
 0x147   :  { %366 = vsyncpa [#allocation4], 1 }
 0x148   :  { %368 = vsyncpa [#allocation4 + $0x1], 1 }

</bundles_post_ra>
